<compile_context>
chip_gen: v7x
topology: tpu7x:2x2x1
jax: 0.10.0
libtpu: 0.0.40
codegen_flags: <defaults>
</compile_context>

<pallas_src>
import jax
import jax.numpy as jnp
from jax.experimental import pallas as pl
from jax.experimental.pallas import tpu as pltpu


def _make_dot_prod_loss_kernel(hw, tile, num_tiles, nb):
    last = num_tiles - 1
    need_mask = (num_tiles * tile) != hw  # static: only the last tile can be partial

    def kernel(x_ref, g_ref, o_ref, acc_ref):
        # x_ref, g_ref : (nb, c, tile)  input blocks
        # o_ref        : (1, nb, 1)     per-batch-block partial sums (written once)
        # acc_ref      : (nb, tile)     lane-wide f32 accumulator, resident across tiles
        i = pl.program_id(1)

        @pl.when(i == 0)
        def _():
            acc_ref[...] = jnp.zeros_like(acc_ref)

        prod = x_ref[...].astype(jnp.float32) * g_ref[...].astype(jnp.float32)
        dots = jnp.sum(prod, axis=1)          # (nb, tile): sum over C
        vals = jnp.abs(1.0 - dots)            # (nb, tile)

        if need_mask:
            # Hot path: unmasked lane-dense add on every non-final tile.
            @pl.when(i != last)
            def _():
                acc_ref[...] += vals

            # Mask only the partial last tile (out-of-bounds columns -> 0).
            @pl.when(i == last)
            def _():
                col = jax.lax.broadcasted_iota(jnp.int32, (nb, tile), 1)
                valid = (last * tile + col) < hw
                acc_ref[...] += jnp.where(valid, vals, jnp.float32(0.0))
        else:
            acc_ref[...] += vals

        @pl.when(i == last)
        def _():
            # One-time cross-lane reduce per batch block, hidden under the last
            # tile's DMA; shrinks HBM writeback from (nb, tile) f32 to nb scalars.
            o_ref[...] = jnp.sum(acc_ref[...], axis=-1, keepdims=True)[None]

    return kernel


def _largest_divisor_leq(n, cap):
    cap = max(1, min(n, cap))
    best = 1
    i = 1
    while i * i <= n:
        if n % i == 0:
            lo, hi = i, n // i
            if lo <= cap and lo > best:
                best = lo
            if hi <= cap and hi > best:
                best = hi
        i += 1
    return best


def dot_prod_loss(inp, gt, *, step_byte_target=4 * 1024 * 1024,
                  vmem_budget_bytes=None, max_tile_cols=None,
                  max_batch_block=None):
    """loss = mean over (N,H,W) of |1 - sum_C(inp * gt)|; inputs are NCHW."""
    assert inp.shape == gt.shape, (inp.shape, gt.shape)
    n, c, h, w = inp.shape
    hw = h * w
    m = n * hw

    # --- hardware-aware VMEM budget --------------------------------------
    try:
        phys_vmem = int(pltpu.get_tpu_info().vmem_capacity_bytes)
    except Exception:  # interpret mode / CPU tracing fallback
        phys_vmem = 64 * 1024 * 1024
    if vmem_budget_bytes is None:
        # Half of physical VMEM: 64 MiB on v5e/v6e (128 MiB phys), 32 MiB on v7x (64 MiB).
        vmem_budget_bytes = min(phys_vmem // 2, 64 * 1024 * 1024)

    # --- per-column cost model (sublane padding + real dtype itemsize) ----
    def _padded_rows(dtype):
        itemsize = jnp.dtype(dtype).itemsize
        mult = max(1, 32 // itemsize)      # 8 for f32, 16 for bf16, 32 for int8
        return (-(-c // mult)) * mult, itemsize

    cpad_x, isx = _padded_rows(inp.dtype)
    cpad_g, isg = _padded_rows(gt.dtype)
    n_buffers = 2                          # double-buffered inputs
    # VMEM bytes per (batch-row, lane-column): padded inputs x buffers + f32 acc
    # (+small fudge for acc sublane padding when nb is tiny).
    per_col_vmem = n_buffers * (cpad_x * isx + cpad_g * isg) + 8
    # HBM bytes actually moved per (batch-row, lane-column).
    per_col_hbm = c * (isx + isg)

    max_cols_vmem = vmem_budget_bytes // per_col_vmem
    if max_cols_vmem < min(hw, 128):
        raise NotImplementedError(
            f"C={c} too large for a single (C, 128) block within "
            f"{vmem_budget_bytes} bytes of VMEM (needs C tiling).")

    cols_target = max(128, -(-step_byte_target // per_col_hbm))

    # --- lane-tile selection ----------------------------------------------
    tile_cap = max_cols_vmem
    if max_tile_cols is not None:
        tile_cap = min(tile_cap, max(128, max_tile_cols))
    if hw <= tile_cap:
        tile = hw                          # full row (allowed even if % 128 != 0)
        num_tiles = 1
    else:
        tile = min(tile_cap, max(cols_target, 512))
        tile = max(128, (tile // 128) * 128)
        num_tiles = pl.cdiv(hw, tile)      # masked remainder tile if needed

    # --- batch blocking: each grid step moves >= ~step_byte_target bytes ---
    nb_cap = max(1, min(max_cols_vmem // tile, -(-cols_target // tile)))
    if max_batch_block is not None:
        nb_cap = min(nb_cap, max(1, max_batch_block))
    nb = _largest_divisor_leq(n, nb_cap)
    num_batch_blocks = n // nb

    # --- VMEM limit from the actual (padded) double-buffered footprint -----
    nb_pad = (-(-nb // 8)) * 8
    block_bytes = n_buffers * nb * tile * (cpad_x * isx + cpad_g * isg)
    acc_bytes = nb_pad * tile * 4
    vmem_limit = min(int(0.9 * phys_vmem), block_bytes + acc_bytes + 8 * 1024 * 1024)
    vmem_limit = max(int(vmem_limit), 16 * 1024 * 1024)

    # --- NCHW -> (N, C, H*W): contiguous reshape, no HBM transpose ----------
    x3 = inp.reshape(n, c, hw)
    g3 = gt.reshape(n, c, hw)

    kernel = _make_dot_prod_loss_kernel(hw, tile, num_tiles, nb)

    partials = pl.pallas_call(
        kernel,
        out_shape=jax.ShapeDtypeStruct((num_batch_blocks, nb, 1), jnp.float32),
        grid_spec=pltpu.PrefetchScalarGridSpec(
            num_scalar_prefetch=0,
            grid=(num_batch_blocks, num_tiles),
            in_specs=[
                pl.BlockSpec((nb, c, tile), lambda b, i: (b, 0, i)),
                pl.BlockSpec((nb, c, tile), lambda b, i: (b, 0, i)),
            ],
            out_specs=pl.BlockSpec((1, nb, 1), lambda b, i: (b, 0, 0)),
            scratch_shapes=[pltpu.VMEM((nb, tile), jnp.float32)],
        ),
        compiler_params=pltpu.CompilerParams(
            # Batch blocks are independent (megacore-parallel); the tile axis is
            # the reduction into the resident accumulator.
            dimension_semantics=("parallel", "arbitrary"),
            vmem_limit_bytes=int(vmem_limit),
        ),
    )(x3, g3)

    # Tiny final reduce (num_batch_blocks * nb scalars) + mean over true count.
    return (jnp.sum(partials) / jnp.float32(m)).astype(jnp.float32)


if __name__ == "__main__":
    key = jax.random.PRNGKey(0)
    k1, k2, k3, k4, k5, k6, k7, k8 = jax.random.split(key, 8)

    def ref_loss(x, g):
        xf = x.astype(jnp.float32)
        gf = g.astype(jnp.float32)
        return jnp.mean(jnp.abs(1.0 - jnp.sum(xf * gf, axis=1)))

    # 1) Primary small NCHW case: single step, full-row tile, batch-blocked (nb=2).
    N, C, H, W = 2, 4, 16, 16
    x = jax.random.normal(k1, (N, C, H, W), dtype=jnp.float32)
    g = jax.random.normal(k2, (N, C, H, W), dtype=jnp.float32)
    loss = jax.block_until_ready(dot_prod_loss(x, g))
    r = ref_loss(x, g)
    assert jnp.allclose(loss, r, rtol=1e-5, atol=1e-5), (loss, r)

    # 2) Multi-tile + masked remainder + multiple batch blocks (nb forced to 1).
    x2 = jax.random.normal(k3, (2, 4, 20, 20), dtype=jnp.float32)
    g2 = jax.random.normal(k4, (2, 4, 20, 20), dtype=jnp.float32)
    loss2 = jax.block_until_ready(
        dot_prod_loss(x2, g2, max_tile_cols=128, max_batch_block=1))
    r2 = ref_loss(x2, g2)
    assert jnp.allclose(loss2, r2, rtol=1e-5, atol=1e-5), (loss2, r2)

    # 3) Batch-blocked nb=2 over 2 batch blocks, odd C, full-row tile not %128.
    x3 = jax.random.normal(k5, (4, 3, 12, 12), dtype=jnp.float32)
    g3 = jax.random.normal(k6, (4, 3, 12, 12), dtype=jnp.float32)
    loss3 = jax.block_until_ready(dot_prod_loss(x3, g3, max_batch_block=2))
    r3 = ref_loss(x3, g3)
    assert jnp.allclose(loss3, r3, rtol=1e-5, atol=1e-5), (loss3, r3)

    # 4) bf16 inputs (exercises dtype-aware sublane padding / itemsize path).
    x4 = jax.random.normal(k7, (2, 4, 16, 16), dtype=jnp.bfloat16)
    g4 = jax.random.normal(k8, (2, 4, 16, 16), dtype=jnp.bfloat16)
    loss4 = jax.block_until_ready(dot_prod_loss(x4, g4))
    r4 = ref_loss(x4, g4)
    assert jnp.allclose(loss4, r4, rtol=1e-4, atol=1e-4), (loss4, r4)

    print("KERNEL_OK")
</pallas_src>

<mosaic_0001>
module attributes {stable_mosaic.version = 11 : i64} {
  func.func @kernel(%arg0: i32, %arg1: i32, %arg2: memref<2x4x256xf32, #tpu.memory_space<vmem>>, %arg3: memref<2x4x256xf32, #tpu.memory_space<vmem>>, %arg4: memref<1x2x1xf32, #tpu.memory_space<vmem>>, %arg5: memref<2x256xf32, #tpu.memory_space<vmem>>) attributes {dimension_semantics = [#tpu.dimension_semantics<parallel>, #tpu.dimension_semantics<arbitrary>], iteration_bounds = array<i64: 1, 1>, scalar_prefetch = 0 : i64, scratch_operands = 1 : i64, tpu.core_type = #tpu.core_type<tc>, window_params = [{transform_indices = @transform_0, window_bounds = array<i64: 2, 4, 256>}, {transform_indices = @transform_1, window_bounds = array<i64: 2, 4, 256>}, {transform_indices = @transform_2, window_bounds = array<i64: 1, 2, 1>}]} {
    %c0_i32 = arith.constant 0 : i32
    %0 = arith.cmpi eq, %arg1, %c0_i32 : i32
    %1 = arith.extui %0 : i1 to i32
    %c0_i32_0 = arith.constant 0 : i32
    %2 = arith.cmpi ne, %1, %c0_i32_0 : i32
    scf.if %2 {
      %cst_13 = arith.constant 0.000000e+00 : f32
      %16 = vector.broadcast %cst_13 : f32 to vector<2x256xf32>
      %c0_14 = arith.constant 0 : index
      %c0_15 = arith.constant 0 : index
      %17 = vector.load %arg5[%c0_14, %c0_15] : memref<2x256xf32, #tpu.memory_space<vmem>>, vector<2x256xf32>
      tpu.vector_store %arg5[%c0_14, %c0_15], %16 {strides = array<i32>} : memref<2x256xf32, #tpu.memory_space<vmem>>, vector<2x256xf32>,
    } else {
    }
    %c0 = arith.constant 0 : index
    %c0_1 = arith.constant 0 : index
    %c0_2 = arith.constant 0 : index
    %3 = vector.load %arg2[%c0, %c0_1, %c0_2] : memref<2x4x256xf32, #tpu.memory_space<vmem>>, vector<2x4x256xf32>
    %c0_3 = arith.constant 0 : index
    %c0_4 = arith.constant 0 : index
    %c0_5 = arith.constant 0 : index
    %4 = vector.load %arg3[%c0_3, %c0_4, %c0_5] : memref<2x4x256xf32, #tpu.memory_space<vmem>>, vector<2x4x256xf32>
    %5 = arith.mulf %3, %4 : vector<2x4x256xf32>
    %cst = arith.constant dense<0.000000e+00> : vector<2x256xf32>
    %6 = vector.multi_reduction <add>, %5, %cst [1] : vector<2x4x256xf32> to vector<2x256xf32>
    %cst_6 = arith.constant 1.000000e+00 : f32
    %7 = vector.broadcast %cst_6 : f32 to vector<2x256xf32>
    %8 = arith.subf %7, %6 : vector<2x256xf32>
    %9 = math.absf %8 : vector<2x256xf32>
    %c0_7 = arith.constant 0 : index
    %c0_8 = arith.constant 0 : index
    %10 = vector.load %arg5[%c0_7, %c0_8] : memref<2x256xf32, #tpu.memory_space<vmem>>, vector<2x256xf32>
    %11 = arith.addf %10, %9 : vector<2x256xf32>
    %c0_9 = arith.constant 0 : index
    %c0_10 = arith.constant 0 : index
    %12 = vector.load %arg5[%c0_9, %c0_10] : memref<2x256xf32, #tpu.memory_space<vmem>>, vector<2x256xf32>
    tpu.vector_store %arg5[%c0_9, %c0_10], %11 {strides = array<i32>} : memref<2x256xf32, #tpu.memory_space<vmem>>, vector<2x256xf32>,
    %c0_i32_11 = arith.constant 0 : i32
    %13 = arith.cmpi eq, %arg1, %c0_i32_11 : i32
    %14 = arith.extui %13 : i1 to i32
    %c0_i32_12 = arith.constant 0 : i32
    %15 = arith.cmpi ne, %14, %c0_i32_12 : i32
    scf.if %15 {
      %c0_13 = arith.constant 0 : index
      %c0_14 = arith.constant 0 : index
      %16 = vector.load %arg5[%c0_13, %c0_14] : memref<2x256xf32, #tpu.memory_space<vmem>>, vector<2x256xf32>
      %cst_15 = arith.constant dense<0.000000e+00> : vector<2xf32>
      %17 = vector.multi_reduction <add>, %16, %cst_15 [1] : vector<2x256xf32> to vector<2xf32>
      %18 = vector.shape_cast %17 : vector<2xf32> to vector<2x1xf32>
      %19 = vector.shape_cast %18 : vector<2x1xf32> to vector<1x2x1xf32>
      %c0_16 = arith.constant 0 : index
      %c0_17 = arith.constant 0 : index
      %c0_18 = arith.constant 0 : index
      %20 = vector.load %arg4[%c0_16, %c0_17, %c0_18] : memref<1x2x1xf32, #tpu.memory_space<vmem>>, vector<1x2x1xf32>
      tpu.vector_store %arg4[%c0_16, %c0_17, %c0_18], %19 {strides = array<i32>} : memref<1x2x1xf32, #tpu.memory_space<vmem>>, vector<1x2x1xf32>,
    } else {
    }
    return
  }
  func.func @transform_0(%arg0: i32, %arg1: i32) -> (i32, i32, i32) {
    %c0_i32 = arith.constant 0 : i32
    %c0_i32_0 = arith.constant 0 : i32
    return %arg0, %c0_i32, %arg1 : i32, i32, i32
  }
  func.func @transform_1(%arg0: i32, %arg1: i32) -> (i32, i32, i32) {
    %c0_i32 = arith.constant 0 : i32
    %c0_i32_0 = arith.constant 0 : i32
    return %arg0, %c0_i32, %arg1 : i32, i32, i32
  }
  func.func @transform_2(%arg0: i32, %arg1: i32) -> (i32, i32, i32) {
    %c0_i32 = arith.constant 0 : i32
    %c0_i32_0 = arith.constant 0 : i32
    %c0_i32_1 = arith.constant 0 : i32
    return %arg0, %c0_i32, %c0_i32_0 : i32, i32, i32
  }
}

</mosaic_0001>

<bundles_post_ra>
// kernel: tpu_custom_call.1
= control target key start
LH: loop header
LB: loop body
LE: loop exit
PB: predicated region body
PF: predicated region fallthrough
CT: control target
= control target key end

     0   :  { %7 = vsyncpa [#allocation4], 0  ;;  %s262_s0 = inlined_call_operand.hbm [shape: f32[2,4,256], index: 0, kind: input, shape index: {}]   ;;  %s263_s1 = inlined_call_operand.hbm [shape: f32[2,4,256], index: 1, kind: input, shape index: {}]   ;;  %s264_s2 = inlined_call_operand.vmem [shape: f32[1,2,1], index: 2, kind: output, shape index: {}]  }
   0x1   :  { %8 = vsyncpa [#allocation6], 0  ;;  %s214_s9 = smov [#allocation3]   ;;  %s166_s13 = scalar_lea.hbm %s262_s0, 256 }
   0x2   :  { %s14_s10 = sshll.u32 %s214_s9, 4  ;;  %p167_p0 = scmp.ne.s32.totalorder %s262_s0, %s166_s13  ;;  %s15_s10 = int_to_ptr.vmem [resolvable:$true] %s14_s10 }
   0x3   :  { %p170_p1 = scmp.lt.u32.totalorder %s166_s13, %s262_s0 }
   0x5   :  { %p172_p2 = pnand %p170_p1, %p167_p0 }
   0x7   :  { %175 = shalt.err (!%p172_p2)
}
   0x8   :  { %s176_s18 = scalar_lea.vmem %s15_s10, 256  ;;  %p181_p4 = scmp.lt.s32.totalorder %s15_s10, %s15_s10 }
   0x9   :  { %p177_p3 = scmp.ne.s32.totalorder %s15_s10, %s176_s18  ;;  %p182_p5 = scmp.lt.s32.totalorder %s176_s18, %s176_s18 }
   0xb   :  { %p183_p6 = por %p182_p5, %p181_p4 }
   0xd   :  { %p184_p7 = pnand %p183_p6, %p177_p3 }
   0xf   :  { %187 = shalt.err (!%p184_p7)
}
  0x10   :  { %s215_s19 = smov 128   ;;  %s216_s20 = smov 8  }
  0x11   :  { %20 = dma.hbm_to_vmem [thread:$0]  %s262_s0, 256, %s15_s10, [#allocation4], %s215_s19, %s215_s19, %s216_s20  }
  0x12   :  { %s217_s23 = smov [#allocation5]   ;;  %s188_s27 = scalar_lea.hbm %s263_s1, 256 }
  0x13   :  { %s26_s24 = sshll.u32 %s217_s23, 4  ;;  %p189_p8 = scmp.ne.s32.totalorder %s263_s1, %s188_s27  ;;  %s27_s24 = int_to_ptr.vmem [resolvable:$true] %s26_s24 }
  0x14   :  { %p192_p9 = scmp.lt.u32.totalorder %s188_s27, %s263_s1 }
  0x16   :  { %p194_p10 = pnand %p192_p9, %p189_p8 }
  0x18   :  { %197 = shalt.err (!%p194_p10)
}
  0x19   :  { %s198_s4 = scalar_lea.vmem %s27_s24, 256  ;;  %p203_p12 = scmp.lt.s32.totalorder %s27_s24, %s27_s24 }
  0x1a   :  { %p199_p11 = scmp.ne.s32.totalorder %s27_s24, %s198_s4  ;;  %p204_p13 = scmp.lt.s32.totalorder %s198_s4, %s198_s4 }
  0x1c   :  { %p205_p0 = por %p204_p13, %p203_p12 }
  0x1e   :  { %p206_p1 = pnand %p205_p0, %p199_p11 }
  0x20   :  { %209 = shalt.err (!%p206_p1)
}
  0x21   :  { %32 = dma.hbm_to_vmem [thread:$0]  %s263_s1, 256, %s27_s24, [#allocation6], %s215_s19, %s215_s19, %s216_s20  }
  0x22   :  { %210 = dma.done.wait [#allocation4], 256  }
  0x23   :  { %211 = vsyncadd [#allocation4], 4294967040 }
  0x24   :  { %212 = dma.done.wait [#allocation6], 256  }
  0x25   :  { %213 = vsyncadd [#allocation6], 4294967040  ;;  %v218_v0 = vmov 0.0   ;;  %v44_v1 = vld [vmem:[#allocation3] sm:$0xff]  ;;  %v45_v2 = vld [vmem:[#allocation3 + $0x8] sm:$0xff]  ;;  %vm56_vm0 = vcmask 1043456   ;;  %v102_v33 = vlaneseq }
  0x26   :  { %43 = vst [vmem:[#allocation2] sm:$0xf] %v218_v0  ;;  %v46_v3 = vld [vmem:[#allocation5] sm:$0xff]  ;;  %v47_v4 = vld [vmem:[#allocation5 + $0x8] sm:$0xff]  ;;  %v219_v31 = vmov 1983009808  }
  0x27   :  { %v48_v5 = vmul.f32 %v46_v3, %v44_v1  ;;  %v49_v6 = vmul.f32 %v47_v4, %v45_v2  ;;  %v100_v32 = vunpack.c.l.s4 %v219_v31  ;;  %v103_v43 = vshrl.u32 %v102_v33, 7 }
  0x28   :  { %vm119_vm1 = vcmask 1041409   ;;  %vm121_vm2 = vcmask 1043459   ;;  %vm123_vm3 = vcmask 1045509   ;;  %vm125_vm4 = vcmask 1047559  }
  0x29   :  { %v52_v7 = vcombine.high %v48_v5, %v48_v5  ;;  %v57_v8 = vsel %vm56_vm0, %v48_v5, 0.0  ;;  %v53_v9 = vcombine.high %v49_v6, %v49_v6  ;;  %v71_v11 = vsel %vm56_vm0, %v49_v6, 0.0 }
  0x2a   :  { %v58_v10 = vrot.slane %v57_v8, 4  ;;  %v72_v13 = vrot.slane %v71_v11, 4  ;;  %v101_v42 = vunpack.c.0.s8 %v100_v32  ;;  %vm145_vm5 = vcmask 1041408  }
  0x2b   :  { %v64_v12 = vsel %vm56_vm0, %v52_v7, 0.0  ;;  %v78_v16 = vsel %vm56_vm0, %v53_v9, 0.0  ;;  %vm151_vm6 = vcmask 1024  }
  0x2c   :  { %v59_v14 = vadd.f32 %v58_v10, %v57_v8  ;;  %v65_v15 = vrot.slane %v64_v12, 4  ;;  %v73_v17 = vadd.f32 %v72_v13, %v71_v11  ;;  %v79_v18 = vrot.slane %v78_v16, 4 }
  0x2d   :  { %v104_v50 = vsub.s32 %v101_v42, %v103_v43  ;;  %v93_v57 = vld [vmem:[#allocation2] sm:$0xf] }
  0x2e   :  { %v60_v19 = vrot.slane %v59_v14, 2  ;;  %v66_v20 = vadd.f32 %v65_v15, %v64_v12  ;;  %v74_v21 = vrot.slane %v73_v17, 2  ;;  %v80_v22 = vadd.f32 %v79_v18, %v78_v16 }
  0x30   :  { %v61_v23 = vadd.f32 %v60_v19, %v59_v14  ;;  %v67_v24 = vrot.slane %v66_v20, 2  ;;  %v75_v25 = vadd.f32 %v74_v21, %v73_v17  ;;  %v81_v26 = vrot.slane %v80_v22, 2 }
  0x32   :  { %v62_v27 = vrot.slane %v61_v23, 1  ;;  %v68_v28 = vadd.f32 %v67_v24, %v66_v20  ;;  %v76_v29 = vrot.slane %v75_v25, 1  ;;  %v82_v30 = vadd.f32 %v81_v26, %v80_v22 }
  0x34   :  { %v63_v34 = vadd.f32 %v62_v27, %v61_v23  ;;  %v69_v35 = vrot.slane %v68_v28, 1  ;;  %v77_v36 = vadd.f32 %v76_v29, %v75_v25  ;;  %v83_v37 = vrot.slane %v82_v30, 1 }
  0x36   :  { %v70_v38 = vadd.f32 %v69_v35, %v68_v28  ;;  %v85_v39 = vsub.f32 1.0, %v63_v34  ;;  %v84_v40 = vadd.f32 %v83_v37, %v82_v30  ;;  %v87_v41 = vsub.f32 1.0, %v77_v36 }
  0x38   :  { %v86_v44 = vsub.f32 1.0, %v70_v38  ;;  %v89_v45 = vand.u32 2147483647, %v85_v39  ;;  %v88_v46 = vsub.f32 1.0, %v84_v40  ;;  %v91_v47 = vand.u32 2147483647, %v87_v41 }
  0x3a   :  { %v90_v48 = vand.u32 2147483647, %v86_v44  ;;  %v92_v49 = vand.u32 2147483647, %v88_v46 }
  0x3c   :  { %v98_v51 = vcombine.low %v89_v45, %v90_v48  ;;  %v106_v52 = vcombine.low %v91_v47, %v92_v49 }
  0x3e   :  { %v105_v53 = vrot.slane %v98_v51, %v104_v50  ;;  %v113_v54 = vrot.slane %v106_v52, %v104_v50 }
  0x40   :  { %v118_v55 = vrot.slane %v113_v54, 7 }
  0x42   :  { %v120_v56 = vsel %vm119_vm1, %v118_v55, %v105_v53 }
  0x43   :  { %v122_v58 = vsel %vm121_vm2, %v118_v55, %v120_v56 }
  0x44   :  { %v124_v59 = vsel %vm123_vm3, %v118_v55, %v122_v58 }
  0x45   :  { %v126_v60 = vsel %vm125_vm4, %v118_v55, %v124_v59 }
  0x46   :  { %v128_v61 = vadd.f32 %v126_v60, %v93_v57 }
  0x48   :  { %129 = vst [vmem:[#allocation2] sm:$0xf] %v128_v61 }
  0x4f   :  { %v159_v62 = vld.sshfl [vmem:[#allocation2] sm:$0x33 pattern:$0x76325410] }
  0x50   :  { %v142_v63 = vcombine.high %v159_v62, %v159_v62  ;;  %v146_v0 = vsel %vm145_vm5, %v159_v62, 0.0 }
  0x52   :  { %v147_v1 = vsel %vm145_vm5, %v142_v63, 0.0 }
  0x53   :  { %v148_v2 = vadd.f32 %v147_v1, %v146_v0 }
  0x55   :  { %149 = vadd.xlane.f32.xlu0 %v148_v2 }
  0xe2   :  { %v150_v3 = vpop.xlane.xlu0 %149 }
  0xe3   :  { %152 = vst.msk [vmem:[%s264_s2] sm:$0x3] %vm151_vm6, %v150_v3 }
  0xe4   :  { %157 = vsyncpa [#allocation4], 1 }
  0xe5   :  { %158 = vsyncpa [#allocation6], 1 }

</bundles_post_ra>
